<compile_context>
chip_gen: v6e
topology: v6e:2x2x1
jax: 0.10.0
libtpu: 0.0.40
codegen_flags: <defaults>
</compile_context>

<pallas_src>
import jax
import jax.numpy as jnp
from jax.experimental import pallas as pl
from jax.experimental.pallas import tpu as pltpu

HIDDEN = 32              # per-modality encoder width
N_CLSS = 3               # classes (MusterModel: PedModel(n_clss=3))
H_PAD = 128              # fused hidden width (3*HIDDEN=96) padded to one lane reg
C_PAD = 128              # class dim padded -> unmasked (lane-dense) output stores
NEG_BIG = -1e30          # bias for pad classes; exp underflows to exactly 0 in f32
MAX_TB = 1024            # hard cap on batch tile
ACT_VMEM_BUDGET = 20 * 1024 * 1024   # budget for double-buffered activation tiles
VMEM_LIMIT = 32 * 1024 * 1024        # scoped VMEM (safe on v5e/v6e/v7x)


def _round_down(x, m):
    return x // m * m


def _cdiv(a, b):
    return (a + b - 1) // b


def _choose_tb(B, row_bytes):
    """Batch tile: multiple of 16, VMEM-budgeted, <= B (partial last block OK),
    split so the 'parallel' grid axis has >=2 tiles for v7x's 2 TCs."""
    if B < 16:
        return B                      # single block; block dim == full array dim
    cap = max(16, _round_down(ACT_VMEM_BUDGET // (2 * row_bytes), 16))
    tb = min(MAX_TB, cap, _round_down(B, 16))
    while tb > 256 and _cdiv(B, tb) < 2:
        tb = max(256, _round_down(tb // 2, 16))
    return tb


# ----------------------------- kernel ---------------------------------------
def ped_kernel(pose_ref, frame_ref, vel_ref,
               w_pose_ref, w_frame_ref, w_vel_ref, b_enc_ref,
               w_cls_ref, b_cls_ref, out_ref):
    # Per-modality encoders fused via lane-disjoint padded weights: each weight
    # writes a disjoint 32-lane band of the 128-wide hidden, so the three f32
    # MXU accumulations simply add (equivalent to one block-diagonal matmul).
    h = jnp.dot(pose_ref[...].astype(jnp.bfloat16), w_pose_ref[...],
                preferred_element_type=jnp.float32)
    h = h + jnp.dot(frame_ref[...].astype(jnp.bfloat16), w_frame_ref[...],
                    preferred_element_type=jnp.float32)
    h = h + jnp.dot(vel_ref[...].astype(jnp.bfloat16), w_vel_ref[...],
                    preferred_element_type=jnp.float32)
    h = jnp.maximum(h + b_enc_ref[...], 0.0)          # ReLU, f32

    # Tiny classifier: bf16 x bf16 -> f32 accumulate.  Padded classes carry a
    # -1e30 bias so they drop out of the softmax.
    logits = jnp.dot(h.astype(jnp.bfloat16), w_cls_ref[...],
                     preferred_element_type=jnp.float32) + b_cls_ref[...]

    # softmax over dim=1 (class axis), exactly as MusterModel.forward
    m = jnp.max(logits, axis=-1, keepdims=True)
    e = jnp.exp(logits - m)
    p = e / jnp.sum(e, axis=-1, keepdims=True)
    out_ref[...] = p.astype(out_ref.dtype)            # lane-dense bf16 store


# ----------------------------- params ---------------------------------------
def init_params(key, d_pose, d_frame, d_vel):
    """Per-modality params, mirroring the PedModel-style head."""
    ks = jax.random.split(key, 4)
    scale = 0.05
    w_pose = scale * jax.random.normal(ks[0], (d_pose, HIDDEN), jnp.float32)
    b_pose = jnp.zeros((1, HIDDEN), jnp.float32)
    w_frame = scale * jax.random.normal(ks[1], (d_frame, HIDDEN), jnp.float32)
    b_frame = jnp.zeros((1, HIDDEN), jnp.float32)
    w_vel = scale * jax.random.normal(ks[2], (d_vel, HIDDEN), jnp.float32)
    b_vel = jnp.zeros((1, HIDDEN), jnp.float32)
    w_cls = scale * jax.random.normal(ks[3], (3 * HIDDEN, N_CLSS), jnp.float32)
    b_cls = jnp.zeros((1, N_CLSS), jnp.float32)
    return (w_pose, b_pose, w_frame, b_frame, w_vel, b_vel, w_cls, b_cls)


def prepare_fused_params(params):
    """Lane-pad each modality weight into a disjoint 32-lane band of the
    128-wide hidden (block-diagonal-equivalent), pad the classifier, cast the
    matmul operands to bf16.  Done once, outside the hot path."""
    (w_pose, b_pose, w_frame, b_frame, w_vel, b_vel, w_cls, b_cls) = params
    H = HIDDEN

    def pad_w(w, band):
        out = jnp.zeros((w.shape[0], H_PAD), jnp.float32)
        out = out.at[:, band * H:(band + 1) * H].set(w)
        return out.astype(jnp.bfloat16)

    w_pose_p = pad_w(w_pose, 0)
    w_frame_p = pad_w(w_frame, 1)
    w_vel_p = pad_w(w_vel, 2)

    b_enc = jnp.zeros((1, H_PAD), jnp.float32)
    b_enc = b_enc.at[:, 0 * H:1 * H].set(b_pose)
    b_enc = b_enc.at[:, 1 * H:2 * H].set(b_frame)
    b_enc = b_enc.at[:, 2 * H:3 * H].set(b_vel)

    w_cls_p = jnp.zeros((H_PAD, C_PAD), jnp.float32)
    w_cls_p = w_cls_p.at[:3 * H, :N_CLSS].set(w_cls).astype(jnp.bfloat16)
    b_cls_p = jnp.full((1, C_PAD), NEG_BIG, jnp.float32)
    b_cls_p = b_cls_p.at[:, :N_CLSS].set(b_cls)

    return (w_pose_p, w_frame_p, w_vel_p, b_enc, w_cls_p, b_cls_p)


# ----------------------------- wrapper ---------------------------------------
@jax.jit
def muster_forward(pose, frame, vel, fused_params):
    """pose: (B, C, T, V); frame: (B, C, H, W) NCHW; vel: (B, T, 2) -> (B, 3) f32."""
    w_pose, w_frame, w_vel, b_enc, w_cls, b_cls = fused_params
    B = pose.shape[0]

    # Raw f32 inputs, flattened (reshape only) -- no concat/cast/pad in HBM.
    xp = pose.reshape(B, -1)
    xf = frame.reshape(B, -1)
    xv = vel.reshape(B, -1)
    dp, df, dv = xp.shape[1], xf.shape[1], xv.shape[1]
    d_total = dp + df + dv

    row_bytes = d_total * 4 + C_PAD * 2        # f32 inputs + bf16 output per row
    TB = _choose_tb(B, row_bytes)
    grid = (_cdiv(B, TB),)
    n_rows = grid[0] * TB

    cost = pl.CostEstimate(
        flops=2 * n_rows * d_total * H_PAD + 2 * n_rows * H_PAD * C_PAD,
        transcendentals=n_rows * C_PAD,
        bytes_accessed=(n_rows * d_total * 4 + n_rows * C_PAD * 2
                        + d_total * H_PAD * 2 + H_PAD * 4
                        + H_PAD * C_PAD * 2 + C_PAD * 4),
    )

    out = pl.pallas_call(
        ped_kernel,
        out_shape=jax.ShapeDtypeStruct((B, C_PAD), jnp.bfloat16),
        grid=grid,
        in_specs=[
            pl.BlockSpec((TB, dp), lambda i: (i, 0)),     # streamed f32 tiles
            pl.BlockSpec((TB, df), lambda i: (i, 0)),
            pl.BlockSpec((TB, dv), lambda i: (i, 0)),
            pl.BlockSpec((dp, H_PAD), lambda i: (0, 0)),  # weights: VMEM-resident
            pl.BlockSpec((df, H_PAD), lambda i: (0, 0)),
            pl.BlockSpec((dv, H_PAD), lambda i: (0, 0)),
            pl.BlockSpec((1, H_PAD), lambda i: (0, 0)),
            pl.BlockSpec((H_PAD, C_PAD), lambda i: (0, 0)),
            pl.BlockSpec((1, C_PAD), lambda i: (0, 0)),
        ],
        out_specs=pl.BlockSpec((TB, C_PAD), lambda i: (i, 0)),
        compiler_params=pltpu.CompilerParams(
            dimension_semantics=("parallel",),
            vmem_limit_bytes=VMEM_LIMIT),
        cost_estimate=cost,
    )(xp, xf, xv, w_pose, w_frame, w_vel, b_enc, w_cls, b_cls)

    # bf16 HBM store halves output traffic; upcast only the (B, 3) slice.
    return out[:, :N_CLSS].astype(jnp.float32)


# ----------------------------- references ------------------------------------
def reference_forward(pose, frame, vel, params):
    """Original-module semantics, full f32."""
    (w_pose, b_pose, w_frame, b_frame, w_vel, b_vel, w_cls, b_cls) = params
    B = pose.shape[0]
    hp = jnp.maximum(pose.reshape(B, -1) @ w_pose + b_pose, 0.0)
    hf = jnp.maximum(frame.reshape(B, -1) @ w_frame + b_frame, 0.0)
    hv = jnp.maximum(vel.reshape(B, -1) @ w_vel + b_vel, 0.0)
    h = jnp.concatenate([hp, hf, hv], axis=-1)
    logits = h @ w_cls + b_cls
    return jax.nn.softmax(logits, axis=1)


def reference_forward_fused(pose, frame, vel, fused_params):
    """Same math as the kernel (bf16 matmul operands, f32 accum, bf16 store)."""
    w_pose, w_frame, w_vel, b_enc, w_cls, b_cls = fused_params
    B = pose.shape[0]
    h = jnp.dot(pose.reshape(B, -1).astype(jnp.bfloat16), w_pose,
                preferred_element_type=jnp.float32)
    h = h + jnp.dot(frame.reshape(B, -1).astype(jnp.bfloat16), w_frame,
                    preferred_element_type=jnp.float32)
    h = h + jnp.dot(vel.reshape(B, -1).astype(jnp.bfloat16), w_vel,
                    preferred_element_type=jnp.float32)
    h = jnp.maximum(h + b_enc, 0.0)
    logits = jnp.dot(h.astype(jnp.bfloat16), w_cls,
                     preferred_element_type=jnp.float32) + b_cls
    p = jax.nn.softmax(logits, axis=-1).astype(jnp.bfloat16)
    return p[:, :N_CLSS].astype(jnp.float32)


# ----------------------------- main ------------------------------------------
if __name__ == "__main__":
    key = jax.random.PRNGKey(0)
    k_pose, k_frame, k_vel, k_param = jax.random.split(key, 4)

    B, C, T, V = 2, 4, 8, 19          # pose keypoint graph
    H, W = 16, 16                     # frame crop (NCHW)
    pose = jax.random.normal(k_pose, (B, C, T, V), jnp.float32)
    frame = jax.random.normal(k_frame, (B, C, H, W), jnp.float32)
    vel = jax.random.normal(k_vel, (B, T, 2), jnp.float32)

    params = init_params(k_param, C * T * V, C * H * W, T * 2)
    fused_params = prepare_fused_params(params)

    out = muster_forward(pose, frame, vel, fused_params)
    out = jax.block_until_ready(out)

    assert out.shape == (B, N_CLSS)
    # Output is stored in bf16 -> sums to 1 up to bf16 rounding of 3 probs.
    assert jnp.allclose(jnp.sum(out, axis=1), 1.0, atol=2e-2)

    # Exact-path check (same bf16/f32 math as the kernel).
    ref_fused = reference_forward_fused(pose, frame, vel, fused_params)
    assert jnp.allclose(out, ref_fused, atol=1e-2, rtol=1e-2)

    # Fidelity to the original f32 module semantics (bf16 quantization slack).
    ref_f32 = reference_forward(pose, frame, vel, params)
    assert jnp.allclose(out, ref_f32, atol=3e-2, rtol=3e-2)

    print("KERNEL_OK")
</pallas_src>

<mosaic_0001>
module attributes {stable_mosaic.version = 11 : i64} {
  func.func @ped_kernel(%arg0: i32, %arg1: memref<2x608xf32, #tpu.memory_space<vmem>>, %arg2: memref<2x1024xf32, #tpu.memory_space<vmem>>, %arg3: memref<2x16xf32, #tpu.memory_space<vmem>>, %arg4: memref<608x128xbf16, #tpu.memory_space<vmem>>, %arg5: memref<1024x128xbf16, #tpu.memory_space<vmem>>, %arg6: memref<16x128xbf16, #tpu.memory_space<vmem>>, %arg7: memref<1x128xf32, #tpu.memory_space<vmem>>, %arg8: memref<128x128xbf16, #tpu.memory_space<vmem>>, %arg9: memref<1x128xf32, #tpu.memory_space<vmem>>, %arg10: memref<2x128xbf16, #tpu.memory_space<vmem>>) attributes {dimension_semantics = [#tpu.dimension_semantics<parallel>], iteration_bounds = array<i64: 1>, scalar_prefetch = 0 : i64, scratch_operands = 0 : i64, tpu.core_type = #tpu.core_type<tc>, window_params = [{transform_indices = @transform_0, window_bounds = array<i64: 2, 608>}, {transform_indices = @transform_1, window_bounds = array<i64: 2, 1024>}, {transform_indices = @transform_2, window_bounds = array<i64: 2, 16>}, {pipeline_mode = #tpu.pipeline_mode<synchronous>, transform_indices = @transform_3, window_bounds = array<i64: 608, 128>}, {pipeline_mode = #tpu.pipeline_mode<synchronous>, transform_indices = @transform_4, window_bounds = array<i64: 1024, 128>}, {pipeline_mode = #tpu.pipeline_mode<synchronous>, transform_indices = @transform_5, window_bounds = array<i64: 16, 128>}, {pipeline_mode = #tpu.pipeline_mode<synchronous>, transform_indices = @transform_6, window_bounds = array<i64: 1, 128>}, {pipeline_mode = #tpu.pipeline_mode<synchronous>, transform_indices = @transform_7, window_bounds = array<i64: 128, 128>}, {pipeline_mode = #tpu.pipeline_mode<synchronous>, transform_indices = @transform_8, window_bounds = array<i64: 1, 128>}, {transform_indices = @transform_9, window_bounds = array<i64: 2, 128>}]} {
    %c0 = arith.constant 0 : index
    %c0_0 = arith.constant 0 : index
    %0 = vector.load %arg1[%c0, %c0_0] : memref<2x608xf32, #tpu.memory_space<vmem>>, vector<2x608xf32>
    %1 = arith.truncf %0 : vector<2x608xf32> to vector<2x608xbf16>
    %c0_1 = arith.constant 0 : index
    %c0_2 = arith.constant 0 : index
    %2 = vector.load %arg4[%c0_1, %c0_2] : memref<608x128xbf16, #tpu.memory_space<vmem>>, vector<608x128xbf16>
    %cst = arith.constant dense<0.000000e+00> : vector<2x128xf32>
    %3 = tpu.matmul %1, %2, %cst {dimension_numbers = #tpu.dot_dimension_numbers<[1], [0], [0], [1], [0, 0, 1, 1], [], []>} : vector<2x608xbf16>, vector<608x128xbf16>, vector<2x128xf32> -> vector<2x128xf32>
    %c0_3 = arith.constant 0 : index
    %c0_4 = arith.constant 0 : index
    %4 = vector.load %arg2[%c0_3, %c0_4] : memref<2x1024xf32, #tpu.memory_space<vmem>>, vector<2x1024xf32>
    %5 = arith.truncf %4 : vector<2x1024xf32> to vector<2x1024xbf16>
    %c0_5 = arith.constant 0 : index
    %c0_6 = arith.constant 0 : index
    %6 = vector.load %arg5[%c0_5, %c0_6] : memref<1024x128xbf16, #tpu.memory_space<vmem>>, vector<1024x128xbf16>
    %cst_7 = arith.constant dense<0.000000e+00> : vector<2x128xf32>
    %7 = tpu.matmul %5, %6, %cst_7 {dimension_numbers = #tpu.dot_dimension_numbers<[1], [0], [0], [1], [0, 0, 1, 1], [], []>} : vector<2x1024xbf16>, vector<1024x128xbf16>, vector<2x128xf32> -> vector<2x128xf32>
    %8 = arith.addf %3, %7 : vector<2x128xf32>
    %c0_8 = arith.constant 0 : index
    %c0_9 = arith.constant 0 : index
    %9 = vector.load %arg3[%c0_8, %c0_9] : memref<2x16xf32, #tpu.memory_space<vmem>>, vector<2x16xf32>
    %10 = arith.truncf %9 : vector<2x16xf32> to vector<2x16xbf16>
    %c0_10 = arith.constant 0 : index
    %c0_11 = arith.constant 0 : index
    %11 = vector.load %arg6[%c0_10, %c0_11] : memref<16x128xbf16, #tpu.memory_space<vmem>>, vector<16x128xbf16>
    %cst_12 = arith.constant dense<0.000000e+00> : vector<2x128xf32>
    %12 = tpu.matmul %10, %11, %cst_12 {dimension_numbers = #tpu.dot_dimension_numbers<[1], [0], [0], [1], [0, 0, 1, 1], [], []>} : vector<2x16xbf16>, vector<16x128xbf16>, vector<2x128xf32> -> vector<2x128xf32>
    %13 = arith.addf %8, %12 : vector<2x128xf32>
    %c0_13 = arith.constant 0 : index
    %c0_14 = arith.constant 0 : index
    %14 = vector.load %arg7[%c0_13, %c0_14] : memref<1x128xf32, #tpu.memory_space<vmem>>, vector<1x128xf32>
    %15 = vector.broadcast %14 : vector<1x128xf32> to vector<2x128xf32>
    %16 = arith.addf %13, %15 : vector<2x128xf32>
    %cst_15 = arith.constant 0.000000e+00 : f32
    %17 = vector.broadcast %cst_15 : f32 to vector<2x128xf32>
    %18 = arith.maximumf %16, %17 : vector<2x128xf32>
    %19 = arith.truncf %18 : vector<2x128xf32> to vector<2x128xbf16>
    %c0_16 = arith.constant 0 : index
    %c0_17 = arith.constant 0 : index
    %20 = vector.load %arg8[%c0_16, %c0_17] : memref<128x128xbf16, #tpu.memory_space<vmem>>, vector<128x128xbf16>
    %cst_18 = arith.constant dense<0.000000e+00> : vector<2x128xf32>
    %21 = tpu.matmul %19, %20, %cst_18 {dimension_numbers = #tpu.dot_dimension_numbers<[1], [0], [0], [1], [0, 0, 1, 1], [], []>} : vector<2x128xbf16>, vector<128x128xbf16>, vector<2x128xf32> -> vector<2x128xf32>
    %c0_19 = arith.constant 0 : index
    %c0_20 = arith.constant 0 : index
    %22 = vector.load %arg9[%c0_19, %c0_20] : memref<1x128xf32, #tpu.memory_space<vmem>>, vector<1x128xf32>
    %23 = vector.broadcast %22 : vector<1x128xf32> to vector<2x128xf32>
    %24 = arith.addf %21, %23 : vector<2x128xf32>
    %cst_21 = arith.constant dense<0xFF800000> : vector<2xf32>
    %25 = vector.multi_reduction <maximumf>, %24, %cst_21 [1] : vector<2x128xf32> to vector<2xf32>
    %26 = vector.shape_cast %25 : vector<2xf32> to vector<2x1xf32>
    %27 = vector.broadcast %26 : vector<2x1xf32> to vector<2x128xf32>
    %28 = arith.subf %24, %27 : vector<2x128xf32>
    %29 = math.exp %28 : vector<2x128xf32>
    %cst_22 = arith.constant dense<0.000000e+00> : vector<2xf32>
    %30 = vector.multi_reduction <add>, %29, %cst_22 [1] : vector<2x128xf32> to vector<2xf32>
    %31 = vector.shape_cast %30 : vector<2xf32> to vector<2x1xf32>
    %32 = vector.broadcast %31 : vector<2x1xf32> to vector<2x128xf32>
    %33 = arith.divf %29, %32 : vector<2x128xf32>
    %34 = arith.truncf %33 : vector<2x128xf32> to vector<2x128xbf16>
    %c0_23 = arith.constant 0 : index
    %c0_24 = arith.constant 0 : index
    %35 = vector.load %arg10[%c0_23, %c0_24] : memref<2x128xbf16, #tpu.memory_space<vmem>>, vector<2x128xbf16>
    tpu.vector_store %arg10[%c0_23, %c0_24], %34 {strides = array<i32>} : memref<2x128xbf16, #tpu.memory_space<vmem>>, vector<2x128xbf16>,
    return
  }
  func.func @transform_0(%arg0: i32) -> (i32, i32) {
    %c0_i32 = arith.constant 0 : i32
    %c0_i32_0 = arith.constant 0 : i32
    return %arg0, %c0_i32 : i32, i32
  }
  func.func @transform_1(%arg0: i32) -> (i32, i32) {
    %c0_i32 = arith.constant 0 : i32
    %c0_i32_0 = arith.constant 0 : i32
    return %arg0, %c0_i32 : i32, i32
  }
  func.func @transform_2(%arg0: i32) -> (i32, i32) {
    %c0_i32 = arith.constant 0 : i32
    %c0_i32_0 = arith.constant 0 : i32
    return %arg0, %c0_i32 : i32, i32
  }
  func.func @transform_3(%arg0: i32) -> (i32, i32) {
    %c0_i32 = arith.constant 0 : i32
    %c0_i32_0 = arith.constant 0 : i32
    %c0_i32_1 = arith.constant 0 : i32
    return %c0_i32, %c0_i32_0 : i32, i32
  }
  func.func @transform_4(%arg0: i32) -> (i32, i32) {
    %c0_i32 = arith.constant 0 : i32
    %c0_i32_0 = arith.constant 0 : i32
    %c0_i32_1 = arith.constant 0 : i32
    return %c0_i32, %c0_i32_0 : i32, i32
  }
  func.func @transform_5(%arg0: i32) -> (i32, i32) {
    %c0_i32 = arith.constant 0 : i32
    %c0_i32_0 = arith.constant 0 : i32
    %c0_i32_1 = arith.constant 0 : i32
    return %c0_i32, %c0_i32_0 : i32, i32
  }
  func.func @transform_6(%arg0: i32) -> (i32, i32) {
    %c0_i32 = arith.constant 0 : i32
    %c0_i32_0 = arith.constant 0 : i32
    %c0_i32_1 = arith.constant 0 : i32
    return %c0_i32, %c0_i32_0 : i32, i32
  }
  func.func @transform_7(%arg0: i32) -> (i32, i32) {
    %c0_i32 = arith.constant 0 : i32
    %c0_i32_0 = arith.constant 0 : i32
    %c0_i32_1 = arith.constant 0 : i32
    return %c0_i32, %c0_i32_0 : i32, i32
  }
  func.func @transform_8(%arg0: i32) -> (i32, i32) {
    %c0_i32 = arith.constant 0 : i32
    %c0_i32_0 = arith.constant 0 : i32
    %c0_i32_1 = arith.constant 0 : i32
    return %c0_i32, %c0_i32_0 : i32, i32
  }
  func.func @transform_9(%arg0: i32) -> (i32, i32) {
    %c0_i32 = arith.constant 0 : i32
    %c0_i32_0 = arith.constant 0 : i32
    return %arg0, %c0_i32 : i32, i32
  }
}

</mosaic_0001>

<bundles_post_ra>
// kernel: muster_forward.1
= control target key start
LH: loop header
LB: loop body
LE: loop exit
PB: predicated region body
PF: predicated region fallthrough
CT: control target
= control target key end

     0   :  { %14 = vsyncpa [#allocation3], 0  ;;  %s2051_s0 = inlined_call_operand.vmem [shape: f32[2,608], index: 0, kind: input, shape index: {}]   ;;  %s2052_s1 = inlined_call_operand.vmem [shape: f32[2,1024], index: 1, kind: input, shape index: {}]   ;;  %s2053_s2 = inlined_call_operand.vmem [shape: f32[2,16], index: 2, kind: input, shape index: {}]   ;;  %s2054_s3 = inlined_call_operand.hbm [shape: bf16[608,128], index: 3, kind: input, shape index: {}]   ;;  %s2055_s4 = inlined_call_operand.hbm [shape: bf16[1024,128], index: 4, kind: input, shape index: {}]   ;;  %s2056_s5 = inlined_call_operand.vmem [shape: bf16[16,128], index: 5, kind: input, shape index: {}]   ;;  %s2057_s6 = inlined_call_operand.vmem [shape: f32[1,128], index: 6, kind: input, shape index: {}]   ;;  %s2058_s7 = inlined_call_operand.vmem [shape: bf16[128,128], index: 7, kind: input, shape index: {}]   ;;  %s2059_s8 = inlined_call_operand.vmem [shape: f32[1,128], index: 8, kind: input, shape index: {}]   ;;  %s2060_s9 = inlined_call_operand.vmem [shape: bf16[2,128], index: 9, kind: output, shape index: {}]  }
   0x1   :  { %15 = vsyncpa [#allocation5], 0  ;;  %s1926_s30 = smov [#allocation2]  }
   0x2   :  { %s27_s10 = sshll.u32 %s1926_s30, 4  ;;  %s28_s10 = int_to_ptr.vmem [resolvable:$true] %s27_s10 }
   0x3   :  { %s1890_s11 = scalar_lea.vmem %s28_s10, 4864  ;;  %p1895_p1 = scmp.lt.s32.totalorder %s28_s10, %s28_s10 }
   0x4   :  { %p1891_p0 = scmp.ne.s32.totalorder %s28_s10, %s1890_s11  ;;  %p1896_p2 = scmp.lt.s32.totalorder %s1890_s11, %s1890_s11 }
   0x6   :  { %p1897_p3 = por %p1896_p2, %p1895_p1 }
   0x8   :  { %p1898_p4 = pnand %p1897_p3, %p1891_p0 }
   0xa   :  { %1901 = shalt.err (!%p1898_p4)
}
   0xb   :  { %s1927_s12 = smov 64   ;;  %s1928_s13 = smov 4  }
   0xc   :  { %33 = dma.hbm_to_vmem [thread:$0]  %s2054_s3, 4864, %s28_s10, [#allocation3], %s1927_s12, %s1927_s12, %s1928_s13  }
   0xd   :  { %s1929_s16 = smov [#allocation4]  }
   0xe   :  { %s39_s17 = sshll.u32 %s1929_s16, 4  ;;  %s40_s17 = int_to_ptr.vmem [resolvable:$true] %s39_s17 }
   0xf   :  { %s1910_s18 = scalar_lea.vmem %s40_s17, 8192  ;;  %p1915_p6 = scmp.lt.s32.totalorder %s40_s17, %s40_s17 }
  0x10   :  { %p1911_p5 = scmp.ne.s32.totalorder %s40_s17, %s1910_s18  ;;  %p1916_p7 = scmp.lt.s32.totalorder %s1910_s18, %s1910_s18 }
  0x12   :  { %p1917_p8 = por %p1916_p7, %p1915_p6 }
  0x14   :  { %p1918_p9 = pnand %p1917_p8, %p1911_p5 }
  0x16   :  { %1921 = shalt.err (!%p1918_p9)
}
  0x17   :  { %45 = dma.hbm_to_vmem [thread:$0]  %s2055_s4, 8192, %s40_s17, [#allocation5], %s1927_s12, %s1927_s12, %s1928_s13  }
  0x18   :  { %1922 = dma.done.wait [#allocation3], 4864  }
  0x19   :  { %1923 = vsyncadd [#allocation3], 4294962432 }
  0x1a   :  { %1924 = dma.done.wait [#allocation5], 8192  }
  0x1b   :  { %1925 = vsyncadd [#allocation5], 4294959104  ;;  %v1764_v0 = vld [vmem:[#allocation4 + $0x78] sm:$0xff]   ;;  %v1768_v4 = vld [vmem:[#allocation4 + $0x70] sm:$0xff]   ;;  %v1930_v22 = vmov 1983009808   ;;  %v69_v24 = vlaneseq }
  0x1c   :  { %v1765_v1 = vld [vmem:[#allocation4 + $0xf8] sm:$0xff]   ;;  %1565 = vmatprep.subr.bf16.mxu0 %v1764_v0  ;;  %v1769_v5 = vld [vmem:[#allocation4 + $0xf0] sm:$0xff]   ;;  %v1772_v8 = vld [vmem:[#allocation4 + $0x68] sm:$0xff]   ;;  %v67_v23 = vunpack.c.l.s4 %v1930_v22  ;;  %vm1932_vm0 = vmmov 0   ;;  %vm1129_vm1 = vcmask 785408   ;;  %vm1263_vm2 = vcmask 130048  }
  0x1d   :  { %v1766_v2 = vld [vmem:[#allocation4 + $0x38] sm:$0xff]   ;;  %1587 = vmatprep.subr.bf16.mxu1 %v1765_v1  ;;  %v1770_v6 = vld [vmem:[#allocation4 + $0x30] sm:$0xff]   ;;  %v1773_v9 = vld [vmem:[#allocation4 + $0xe8] sm:$0xff]   ;;  %v70_v30 = vshrl.u32 %v69_v24, 7  ;;  %vm1429_vm3 = vcmask 1041408  }
  0x1e   :  { %v1767_v3 = vld [vmem:[#allocation4 + $0xb8] sm:$0xff]   ;;  %1566 = vmatpush3.bf16.msra.mxu0 %v1766_v2  ;;  %v1771_v7 = vld [vmem:[#allocation4 + $0xb0] sm:$0xff]   ;;  %v1774_v10 = vld [vmem:[#allocation4 + $0x28] sm:$0xff]   ;;  %v68_v29 = vunpack.c.0.s8 %v67_v23 }
  0x1f   :  { %1588 = vmatpush3.bf16.msra.mxu1 %v1767_v3  ;;  %1567 = vmatprep.subr.bf16.mxu0 %v1768_v4  ;;  %v1775_v11 = vld [vmem:[#allocation4 + $0xa8] sm:$0xff]   ;;  %v1776_v12 = vld [vmem:[#allocation4 + $0x60] sm:$0xff]   ;;  %v1780_v16 = vld [vmem:[#allocation4 + $0x58] sm:$0xff]  }
  0x20   :  { %1589 = vmatprep.subr.bf16.mxu1 %v1769_v5  ;;  %v1777_v13 = vld [vmem:[#allocation4 + $0xe0] sm:$0xff]   ;;  %v1781_v17 = vld [vmem:[#allocation4 + $0xd8] sm:$0xff]   ;;  %v1784_v20 = vld [vmem:[#allocation4 + $0x50] sm:$0xff]   ;;  %v1989_v35 = vsub.s32 %v68_v29, %v70_v30 }
  0x21   :  { %v1778_v14 = vld [vmem:[#allocation4 + $0x20] sm:$0xff]   ;;  %v1782_v18 = vld [vmem:[#allocation4 + $0x18] sm:$0xff]   ;;  %v1785_v21 = vld [vmem:[#allocation4 + $0xd0] sm:$0xff]  }
  0x22   :  { %1568 = vmatpush3.bf16.msra.mxu0 %v1770_v6  ;;  %v1779_v15 = vld [vmem:[#allocation4 + $0xa0] sm:$0xff]   ;;  %v1783_v19 = vld [vmem:[#allocation4 + $0x98] sm:$0xff]   ;;  %v1786_v25 = vld [vmem:[#allocation4 + $0x10] sm:$0xff]  }
  0x23   :  { %1590 = vmatpush3.bf16.msra.mxu1 %v1771_v7  ;;  %1569 = vmatprep.subr.bf16.mxu0 %v1772_v8  ;;  %v1787_v26 = vld [vmem:[#allocation4 + $0x90] sm:$0xff]   ;;  %v1788_v27 = vld [vmem:[#allocation4 + $0x48] sm:$0xff]   ;;  %v1792_v33 = vld [vmem:[#allocation4 + $0x40] sm:$0xff]  }
  0x24   :  { %1591 = vmatprep.subr.bf16.mxu1 %v1773_v9  ;;  %v1789_v28 = vld [vmem:[#allocation4 + $0xc8] sm:$0xff]   ;;  %v1793_v34 = vld [vmem:[#allocation4 + $0xc0] sm:$0xff]   ;;  %v175_v38 = vld [vmem:[%s2052_s1] sm:$0xff] }
  0x25   :  { %v1790_v31 = vld [vmem:[#allocation4 + $0x8] sm:$0xff]   ;;  %v1794_v36 = vld [vmem:[#allocation4] sm:$0xff]   ;;  %v186_v39 = vrot.slane %v175_v38, %v1989_v35  ;;  %v179_v40 = vcombine.high %v175_v38, %v175_v38  ;;  %v1797_v41 = vld [vmem:[#allocation4 + $0x178] sm:$0xff]  }
  0x26   :  { %1570 = vmatpush3.bf16.msra.mxu0 %v1774_v10  ;;  %v1791_v32 = vld [vmem:[#allocation4 + $0x88] sm:$0xff]   ;;  %v1795_v37 = vld [vmem:[#allocation4 + $0x80] sm:$0xff]   ;;  %v1799_v44 = vld [vmem:[#allocation4 + $0x1f8] sm:$0xff]  }
  0x27   :  { %1592 = vmatpush3.bf16.msra.mxu1 %v1775_v11  ;;  %1571 = vmatprep.subr.bf16.mxu0 %v1776_v12  ;;  %v194_v42 = vcombine.high %v186_v39, %v186_v39  ;;  %v193_v43 = vrot.slane %v179_v40, %v1989_v35  ;;  %v221_v45 = vpack.c.bf16 %v186_v39, %v186_v39  ;;  %v1798_v48 = vld [vmem:[#allocation4 + $0x138] sm:$0xff]   ;;  %v1801_v50 = vld [vmem:[#allocation4 + $0x170] sm:$0xff]   ;;  %v1805_v55 = vld [vmem:[#allocation4 + $0x168] sm:$0xff]  }
  0x28   :  { %1593 = vmatprep.subr.bf16.mxu1 %v1777_v13  ;;  %v1800_v52 = vld [vmem:[#allocation4 + $0x1b8] sm:$0xff]   ;;  %v1803_v53 = vld [vmem:[#allocation4 + $0x1f0] sm:$0xff]   ;;  %v1807_v57 = vld [vmem:[#allocation4 + $0x1e8] sm:$0xff]  }
  0x29   :  { %v222_v46 = vpack.c.bf16 %v194_v42, %v194_v42  ;;  %v195_v47 = vcombine.high %v193_v43, %v193_v43  ;;  %v223_v49 = vpack.c.bf16 %v193_v43, %v193_v43  ;;  %v1802_v54 = vld [vmem:[#allocation4 + $0x130] sm:$0xff]   ;;  %v1806_v58 = vld [vmem:[#allocation4 + $0x128] sm:$0xff]   ;;  %v1809_v59 = vld [vmem:[#allocation4 + $0x160] sm:$0xff]  }
  0x2a   :  { %1572 = vmatpush3.bf16.msra.mxu0 %v1778_v14  ;;  %v1804_v56 = vld [vmem:[#allocation4 + $0x1b0] sm:$0xff]   ;;  %v1808_v60 = vld [vmem:[#allocation4 + $0x1a8] sm:$0xff]   ;;  %v1811_v61 = vld [vmem:[#allocation4 + $0x1e0] sm:$0xff]  }
  0x2b   :  { %1594 = vmatpush3.bf16.msra.mxu1 %v1779_v15  ;;  %1573 = vmatprep.subr.bf16.mxu0 %v1780_v16  ;;  %v224_v51 = vpack.c.bf16 %v195_v47, %v195_v47  ;;  %v1810_v62 = vld [vmem:[#allocation4 + $0x120] sm:$0xff]   ;;  %v1813_v63 = vld [vmem:[#allocation4 + $0x158] sm:$0xff]   ;;  %v1817_v3 = vld [vmem:[#allocation4 + $0x150] sm:$0xff]  }
  0x2c   :  { %1595 = vmatprep.subr.bf16.mxu1 %v1781_v17  ;;  %773 = vmatprep.mubr.bf16.mxu0 %v222_v46  ;;  %v1812_v0 = vld [vmem:[#allocation4 + $0x1a0] sm:$0xff]   ;;  %v1815_v1 = vld [vmem:[#allocation4 + $0x1d8] sm:$0xff]   ;;  %v1819_v5 = vld [vmem:[#allocation4 + $0x1d0] sm:$0xff]  }
  0x2d   :  { %813 = vmatprep.mubr.bf16.mxu1 %v224_v51  ;;  %v1814_v2 = vld [vmem:[#allocation4 + $0x118] sm:$0xff]   ;;  %v1818_v6 = vld [vmem:[#allocation4 + $0x110] sm:$0xff]   ;;  %v1821_v7 = vld [vmem:[#allocation4 + $0x148] sm:$0xff]  }
  0x2e   :  { %1574 = vmatpush3.bf16.msra.mxu0 %v1782_v18  ;;  %v1816_v4 = vld [vmem:[#allocation4 + $0x198] sm:$0xff]   ;;  %v1820_v8 = vld [vmem:[#allocation4 + $0x190] sm:$0xff]   ;;  %v1823_v9 = vld [vmem:[#allocation4 + $0x1c8] sm:$0xff]  }
  0x2f   :  { %1596 = vmatpush3.bf16.msra.mxu1 %v1783_v19  ;;  %1575 = vmatprep.subr.bf16.mxu0 %v1784_v20  ;;  %v1822_v10 = vld [vmem:[#allocation4 + $0x108] sm:$0xff]   ;;  %v1825_v11 = vld [vmem:[#allocation4 + $0x140] sm:$0xff]   ;;  %v176_v13 = vld [vmem:[%s2052_s1 + $0x8] sm:$0xff] }
  0x30   :  { %1597 = vmatprep.subr.bf16.mxu1 %v1785_v21  ;;  %v1824_v12 = vld [vmem:[#allocation4 + $0x188] sm:$0xff]   ;;  %v1827_v14 = vld [vmem:[#allocation4 + $0x1c0] sm:$0xff]   ;;  %v203_v15 = vrot.slane %v176_v13, %v1989_v35  ;;  %v196_v16 = vcombine.high %v176_v13, %v176_v13  ;;  %v1842_v38 = vld [vmem:[#allocation2 + $0x60] sm:$0xff]  }
  0x31   :  { %v1826_v17 = vld [vmem:[#allocation4 + $0x100] sm:$0xff]   ;;  %v1829_v19 = vld [vmem:[#allocation2 + $0x78] sm:$0xff]   ;;  %v1841_v39 = vld [vmem:[#allocation2 + $0xa8] sm:$0xff]  }
  0x32   :  { %1576 = vmatpush3.bf16.msra.mxu0 %v1786_v25  ;;  %v211_v18 = vcombine.high %v203_v15, %v203_v15  ;;  %v210_v20 = vrot.slane %v196_v16, %v1989_v35  ;;  %v1828_v21 = vld [vmem:[#allocation4 + $0x180] sm:$0xff]   ;;  %v225_v23 = vpack.c.bf16 %v203_v15, %v203_v15  ;;  %v1831_v25 = vld [vmem:[#allocation2 + $0x38] sm:$0xff]   ;;  %v1844_v40 = vld [vmem:[#allocation2 + $0xe0] sm:$0xff]  }
  0x33   :  { %1598 = vmatpush3.bf16.msra.mxu1 %v1787_v26  ;;  %1577 = vmatprep.subr.bf16.mxu0 %v1788_v27  ;;  %v1832_v26 = vld [vmem:[#allocation2 + $0xf8] sm:$0xff]   ;;  %v1834_v29 = vld [vmem:[#allocation2 + $0x70] sm:$0xff]   ;;  %v1845_v43 = vld [vmem:[#allocation2 + $0xa0] sm:$0xff]  }
  0x34   :  { %1599 = vmatprep.subr.bf16.mxu1 %v1789_v28  ;;  %v226_v22 = vpack.c.bf16 %v211_v18, %v211_v18  ;;  %v212_v24 = vcombine.high %v210_v20, %v210_v20  ;;  %v227_v28 = vpack.c.bf16 %v210_v20, %v210_v20  ;;  %v1833_v30 = vld [vmem:[#allocation2 + $0xb8] sm:$0xff]   ;;  %v1850_v46 = vld [vmem:[#allocation2 + $0x50] sm:$0xff]   ;;  %v1869_v13 = vld [vmem:[%s2056_s5] sm:$0xff]  }
  0x35   :  { %v1846_v42 = vld [vmem:[#allocation2 + $0x58] sm:$0xff]   ;;  %v1853_v51 = vld [vmem:[#allocation2 + $0x90] sm:$0xff]   ;;  %v1872_v18 = vld [vmem:[%s2058_s7 + $0x28] sm:$0xff]  }
  0x36   :  { %1578 = vmatpush3.bf16.msra.mxu0 %v1790_v31  ;;  %v228_v27 = vpack.c.bf16 %v212_v24, %v212_v24  ;;  %v1836_v31 = vld [vmem:[#allocation2 + $0xf0] sm:$0xff]   ;;  %v1849_v47 = vld [vmem:[#allocation2 + $0x98] sm:$0xff]  }
  0x37   :  { %1600 = vmatpush3.bf16.msra.mxu1 %v1791_v32  ;;  %1579 = vmatprep.subr.bf16.mxu0 %v1792_v33  ;;  %v1835_v32 = vld [vmem:[#allocation2 + $0x30] sm:$0xff]   ;;  %v1838_v33 = vld [vmem:[#allocation2 + $0x68] sm:$0xff]   ;;  %v1870_v16 = vld [vmem:[%s2058_s7 + $0x38] sm:$0xff]  }
  0x38   :  { %1601 = vmatprep.subr.bf16.mxu1 %v1793_v34  ;;  %v1837_v34 = vld [vmem:[#allocation2 + $0xb0] sm:$0xff]   ;;  %v1874_v20 = vld [vmem:[%s2058_s7 + $0x18] sm:$0xff]  }
  0x3a   :  { %1580 = vmatpush3.bf16.msra.mxu0 %v1794_v36  ;;  %v1840_v36 = vld [vmem:[#allocation2 + $0xe8] sm:$0xff]  }
  0x3b   :  { %1602 = vmatpush3.bf16.msra.mxu1 %v1795_v37  ;;  %1609 = vmatprep.subr.bf16.mxu0 %v1797_v41  ;;  %v1839_v37 = vld [vmem:[#allocation2 + $0x28] sm:$0xff]   ;;  %v1843_v41 = vld [vmem:[#allocation2 + $0x20] sm:$0xff]  }
  0x3c   :  { %1631 = vmatprep.subr.bf16.mxu1 %v1799_v44  ;;  %v1848_v44 = vld [vmem:[#allocation2 + $0xd8] sm:$0xff]  }
  0x3d   :  { %774 = vmatmul.mubr.bf16.vlgmr.msra.gmra.mxu0 %v221_v45  ;;  %v1847_v45 = vld [vmem:[#allocation2 + $0x18] sm:$0xff]  }
  0x3e   :  { %1610 = vmatpush3.bf16.msra.mxu0 %v1798_v48  ;;  %814 = vmatmul.mubr.bf16.vlgmr.msra.gmra.mxu1 %v223_v49  ;;  %v1852_v48 = vld [vmem:[#allocation2 + $0xd0] sm:$0xff]  }
  0x3f   :  { %1611 = vmatprep.subr.bf16.mxu0 %v1801_v50  ;;  %1632 = vmatpush3.bf16.msra.mxu1 %v1800_v52  ;;  %v1851_v49 = vld [vmem:[#allocation2 + $0x10] sm:$0xff]   ;;  %v1854_v50 = vld [vmem:[#allocation2 + $0x48] sm:$0xff]  }
  0x40   :  { %1633 = vmatprep.subr.bf16.mxu1 %v1803_v53  ;;  %853 = vmatprep.mubr.bf16.mxu0 %v226_v22  ;;  %v1856_v52 = vld [vmem:[#allocation2 + $0xc8] sm:$0xff]  }
  0x41   :  { %893 = vmatprep.mubr.bf16.mxu1 %v228_v27  ;;  %v1855_v53 = vld [vmem:[#allocation2 + $0x8] sm:$0xff]  }
  0x42   :  { %1612 = vmatpush3.bf16.msra.mxu0 %v1802_v54  ;;  %v1858_v54 = vld [vmem:[#allocation2 + $0x40] sm:$0xff]   ;;  %v1876_v22 = vld [vmem:[%s2058_s7 + $0x8] sm:$0xff]  }
  0x43   :  { %1613 = vmatprep.subr.bf16.mxu0 %v1805_v55  ;;  %1634 = vmatpush3.bf16.msra.mxu1 %v1804_v56  ;;  %v1857_v55 = vld [vmem:[#allocation2 + $0x88] sm:$0xff]   ;;  %v61_v56 = vld [vmem:[%s2051_s0] sm:$0xff] }
  0x44   :  { %1635 = vmatprep.subr.bf16.mxu1 %v1807_v57  ;;  %v1860_v57 = vld [vmem:[#allocation2 + $0xc0] sm:$0xff]  }
  0x46   :  { %1614 = vmatpush3.bf16.msra.mxu0 %v1806_v58  ;;  %v72_v58 = vrot.slane %v61_v56, %v1989_v35 }
  0x47   :  { %1615 = vmatprep.subr.bf16.mxu0 %v1809_v59  ;;  %1636 = vmatpush3.bf16.msra.mxu1 %v1808_v60  ;;  %v65_v59 = vcombine.high %v61_v56, %v61_v56  ;;  %v1859_v60 = vld [vmem:[#allocation2] sm:$0xff]  }
  0x48   :  { %1637 = vmatprep.subr.bf16.mxu1 %v1811_v61  ;;  %v80_v61 = vcombine.high %v72_v58, %v72_v58 }
  0x4a   :  { %1616 = vmatpush3.bf16.msra.mxu0 %v1810_v62  ;;  %v79_v62 = vrot.slane %v65_v59, %v1989_v35  ;;  %v1865_v35 = vld [vmem:[#allocation2 + $0x118] sm:$0xff]  }
  0x4b   :  { %1617 = vmatprep.subr.bf16.mxu0 %v1813_v63  ;;  %1638 = vmatpush3.bf16.msra.mxu1 %v1812_v0  ;;  %v1861_v63 = vld [vmem:[#allocation2 + $0x80] sm:$0xff]   ;;  %v95_v0 = vpack.c.bf16 %v80_v61, %v80_v61 }
  0x4c   :  { %1639 = vmatprep.subr.bf16.mxu1 %v1815_v1  ;;  %v94_v1 = vpack.c.bf16 %v72_v58, %v72_v58 }
  0x4e   :  { %1618 = vmatpush3.bf16.msra.mxu0 %v1814_v2  ;;  %v81_v2 = vcombine.high %v79_v62, %v79_v62 }
  0x4f   :  { %1619 = vmatprep.subr.bf16.mxu0 %v1817_v3  ;;  %1640 = vmatpush3.bf16.msra.mxu1 %v1816_v4  ;;  %v1863_v3 = vld [vmem:[#allocation2 + $0x128] sm:$0xff]   ;;  %v1931_v4 = vmov 0.0  }
  0x50   :  { %1641 = vmatprep.subr.bf16.mxu1 %v1819_v5  ;;  %v97_v5 = vpack.c.bf16 %v81_v2, %v81_v2  ;;  %v1555_v2 = vld [vmem:[%s2057_s6] ss:$0 sm:$0xff] }
  0x52   :  { %1620 = vmatpush3.bf16.msra.mxu0 %v1818_v6  ;;  %v96_v6 = vpack.c.bf16 %v79_v62, %v79_v62 }
  0x53   :  { %1621 = vmatprep.subr.bf16.mxu0 %v1821_v7  ;;  %1642 = vmatpush3.bf16.msra.mxu1 %v1820_v8  ;;  %v1864_v7 = vld [vmem:[#allocation2 + $0x120] sm:$0xff]   ;;  %v1866_v8 = vld [vmem:[#allocation2 + $0x110] sm:$0xff]  }
  0x54   :  { %1643 = vmatprep.subr.bf16.mxu1 %v1823_v9  ;;  %v1867_v9 = vld [vmem:[#allocation2 + $0x108] sm:$0xff]  }
  0x56   :  { %1622 = vmatpush3.bf16.msra.mxu0 %v1822_v10  ;;  %v1868_v10 = vld [vmem:[#allocation2 + $0x100] sm:$0xff]  }
  0x57   :  { %1623 = vmatprep.subr.bf16.mxu0 %v1825_v11  ;;  %1644 = vmatpush3.bf16.msra.mxu1 %v1824_v12  ;;  %v1449_v11 = vld.sshfl [vmem:[%s2051_s0 + $0x8] sm:$0x3 pattern:$0x76325410] }
  0x58   :  { %1645 = vmatprep.subr.bf16.mxu1 %v1827_v14  ;;  %v98_v12 = vpack.c.bf16 %v1449_v11, %v1449_v11  ;;  %v1253_v14 = vld [vmem:[%s2053_s2] sm:$0x3] }
  0x59   :  { %v1254_v15 = vpack.c.bf16 %v1253_v14, %v1253_v14 }
  0x5a   :  { %1624 = vmatpush3.bf16.msra.mxu0 %v1826_v17  ;;  %v1871_v17 = vld [vmem:[%s2058_s7 + $0x30] sm:$0xff]  }
  0x5b   :  { %1653 = vmatprep.subr.bf16.mxu0 %v1829_v19  ;;  %1646 = vmatpush3.bf16.msra.mxu1 %v1828_v21  ;;  %v1873_v19 = vld [vmem:[%s2058_s7 + $0x20] sm:$0xff]   ;;  %v1875_v21 = vld [vmem:[%s2058_s7 + $0x10] sm:$0xff]  }
  0x5c   :  { %1675 = vmatprep.subr.bf16.mxu1 %v1832_v26 }
  0x5d   :  { %854 = vmatmul.mubr.bf16.vlgmr.msra.gmra.mxu0 %v225_v23  ;;  %v1877_v23 = vld [vmem:[%s2058_s7] sm:$0xff]  }
  0x5e   :  { %1654 = vmatpush3.bf16.msra.mxu0 %v1831_v25  ;;  %894 = vmatmul.mubr.bf16.vlgmr.msra.gmra.mxu1 %v227_v28 }
  0x5f   :  { %1655 = vmatprep.subr.bf16.mxu0 %v1834_v29  ;;  %1676 = vmatpush3.bf16.msra.mxu1 %v1833_v30 }
  0x60   :  { %1677 = vmatprep.subr.bf16.mxu1 %v1836_v31  ;;  %1165 = vmatprep.mubr.bf16.mxu0 %v95_v0 }
  0x61   :  { %1205 = vmatprep.mubr.bf16.mxu1 %v97_v5 }
  0x62   :  { %1656 = vmatpush3.bf16.msra.mxu0 %v1835_v32 }
  0x63   :  { %1657 = vmatprep.subr.bf16.mxu0 %v1838_v33  ;;  %1678 = vmatpush3.bf16.msra.mxu1 %v1837_v34 }
  0x64   :  { %1679 = vmatprep.subr.bf16.mxu1 %v1840_v36 }
  0x66   :  { %1658 = vmatpush3.bf16.msra.mxu0 %v1839_v37 }
  0x67   :  { %1659 = vmatprep.subr.bf16.mxu0 %v1842_v38  ;;  %1680 = vmatpush3.bf16.msra.mxu1 %v1841_v39 }
  0x68   :  { %1681 = vmatprep.subr.bf16.mxu1 %v1844_v40 }
  0x6a   :  { %1660 = vmatpush3.bf16.msra.mxu0 %v1843_v41 }
  0x6b   :  { %1661 = vmatprep.subr.bf16.mxu0 %v1846_v42  ;;  %1682 = vmatpush3.bf16.msra.mxu1 %v1845_v43 }
  0x6c   :  { %1683 = vmatprep.subr.bf16.mxu1 %v1848_v44 }
  0x6e   :  { %1662 = vmatpush3.bf16.msra.mxu0 %v1847_v45 }
  0x6f   :  { %1663 = vmatprep.subr.bf16.mxu0 %v1850_v46  ;;  %1684 = vmatpush3.bf16.msra.mxu1 %v1849_v47 }
  0x70   :  { %1685 = vmatprep.subr.bf16.mxu1 %v1852_v48 }
  0x72   :  { %1664 = vmatpush3.bf16.msra.mxu0 %v1851_v49 }
  0x73   :  { %1665 = vmatprep.subr.bf16.mxu0 %v1854_v50  ;;  %1686 = vmatpush3.bf16.msra.mxu1 %v1853_v51 }
  0x74   :  { %1687 = vmatprep.subr.bf16.mxu1 %v1856_v52 }
  0x76   :  { %1666 = vmatpush3.bf16.msra.mxu0 %v1855_v53 }
  0x77   :  { %1667 = vmatprep.subr.bf16.mxu0 %v1858_v54  ;;  %1688 = vmatpush3.bf16.msra.mxu1 %v1857_v55 }
  0x78   :  { %1689 = vmatprep.subr.bf16.mxu1 %v1860_v57 }
  0x7a   :  { %1668 = vmatpush3.bf16.msra.mxu0 %v1859_v60 }
  0x7b   :  { %1715 = vmatprep.subr.bf16.mxu0 %v1931_v4  ;;  %1690 = vmatpush3.bf16.msra.mxu1 %v1861_v63 }
  0x7c   :  { %1737 = vmatprep.subr.bf16.mxu1 %v1931_v4 }
  0x7d   :  { %1166 = vmatmul.mubr.bf16.vlgmr.msra.gmra.mxu0 %v94_v1 }
  0x7e   :  { %1716 = vmatpush3.bf16.msra.mxu0 %v1863_v3  ;;  %1727 = vmatprep.mubr.msk.bf16.mxu0 %vm1932_vm0, %v1931_v4 }
  0x7f   :  { %1206 = vmatmul.mubr.bf16.vlgmr.msra.gmra.mxu1 %v96_v6  ;;  %1717 = vmatprep.subr.bf16.mxu0 %v1931_v4 }
  0x80   :  { %1753 = vmatprep.mubr.msk.bf16.mxu1 %vm1932_vm0, %v1931_v4  ;;  %1738 = vmatpush3.bf16.msra.mxu1 %v1870_v16 }
  0x81   :  { %1739 = vmatprep.subr.bf16.mxu1 %v1931_v4 }
  0x82   :  { %1718 = vmatpush3.bf16.msra.mxu0 %v1864_v7 }
  0x83   :  { %1719 = vmatprep.subr.bf16.mxu0 %v1931_v4 }
  0x84   :  { %1740 = vmatpush3.bf16.msra.mxu1 %v1871_v17 }
  0x85   :  { %1741 = vmatprep.subr.bf16.mxu1 %v1931_v4 }
  0x86   :  { %1720 = vmatpush3.bf16.msra.mxu0 %v1865_v35 }
  0x87   :  { %1721 = vmatprep.subr.bf16.mxu0 %v1931_v4 }
  0x88   :  { %1742 = vmatpush3.bf16.msra.mxu1 %v1872_v18 }
  0x89   :  { %1743 = vmatprep.subr.bf16.mxu1 %v1931_v4 }
  0x8a   :  { %1722 = vmatpush3.bf16.msra.mxu0 %v1866_v8 }
  0x8b   :  { %1723 = vmatprep.subr.bf16.mxu0 %v1931_v4 }
  0x8c   :  { %1744 = vmatpush3.bf16.msra.mxu1 %v1873_v19 }
  0x8d   :  { %1745 = vmatprep.subr.bf16.mxu1 %v1931_v4 }
  0x8e   :  { %1724 = vmatpush3.bf16.msra.mxu0 %v1867_v9  ;;  %v1556_v9 = vld [vmem:[%s2059_s8] ss:$0 sm:$0xff] }
  0x8f   :  { %1725 = vmatprep.subr.bf16.mxu0 %v1931_v4 }
  0x90   :  { %1746 = vmatpush3.bf16.msra.mxu1 %v1874_v20 }
  0x91   :  { %1747 = vmatprep.subr.bf16.mxu1 %v1931_v4 }
  0x92   :  { %1726 = vmatpush3.bf16.msra.mxu0 %v1868_v10 }
  0x93   :  { %1731 = vmatprep.subr.bf16.mxu0 %v1931_v4 }
  0x94   :  { %1748 = vmatpush3.bf16.msra.mxu1 %v1875_v21 }
  0x95   :  { %1728 = vmatmul.mubr.msk.bf16.vlgmr.msra.gmra.mxu0 %vm1129_vm1, %v98_v12  ;;  %1749 = vmatprep.subr.bf16.mxu1 %v1931_v4 }
  0x96   :  { %1732 = vmatpush3.bf16.msra.mxu0 %v1869_v13  ;;  %1733 = vmatprep.mubr.msk.bf16.mxu0 %vm1932_vm0, %v1931_v4 }
  0x98   :  { %1750 = vmatpush3.bf16.msra.mxu1 %v1876_v22 }
  0x99   :  { %1751 = vmatprep.subr.bf16.mxu1 %v1931_v4 }
  0x9c   :  { %1752 = vmatpush3.bf16.msra.mxu1 %v1877_v23 }
  0x9d   :  { %1734 = vmatmul.mubr.msk.bf16.vlgmr.msra.gmra.mxu0 %vm1263_vm2, %v1254_v15 }
  0xfd   :  { %v1581_v24 = vpop.f32.mrf.mxu0 }
  0xfe   :  { %v1603_v25 = vpop.f32.mrf.mxu1 }
  0xff   :  { %v1582_v26 = vpop.f32.mrf.mxu0 }
 0x100   :  { %v1583_v27 = vadd.f32 %v1582_v26, %v1581_v24  ;;  %v1604_v28 = vpop.f32.mrf.mxu1 }
 0x101   :  { %v1584_v29 = vpop.f32.mrf.mxu0  ;;  %v1605_v30 = vadd.f32 %v1604_v28, %v1603_v25 }
 0x102   :  { %v1606_v32 = vpop.f32.mrf.mxu1 }
 0x103   :  { %v1585_v31 = vpop.f32.mrf.mxu0  ;;  %v816_v33 = vadd.f32 %v1605_v30, %v1583_v27 }
 0x104   :  { %v1607_v34 = vpop.f32.mrf.mxu1 }
 0x11d   :  { %v1625_v36 = vpop.f32.mrf.mxu0 }
 0x11e   :  { %v1647_v38 = vpop.f32.mrf.mxu1 }
 0x11f   :  { %v1626_v37 = vpop.f32.mrf.mxu0 }
 0x120   :  { %v1648_v40 = vpop.f32.mrf.mxu1  ;;  %v1627_v52 = vadd.f32 %v1626_v37, %v1625_v36 }
 0x121   :  { %v1628_v39 = vpop.f32.mrf.mxu0  ;;  %v1649_v54 = vadd.f32 %v1648_v40, %v1647_v38 }
 0x122   :  { %v1650_v42 = vpop.f32.mrf.mxu1  ;;  %v856_v53 = vadd.f32 %v1627_v52, %v816_v33 }
 0x123   :  { %v1629_v41 = vpop.f32.mrf.mxu0 }
 0x124   :  { %v1651_v43 = vpop.f32.mrf.mxu1  ;;  %v896_v56 = vadd.f32 %v1649_v54, %v856_v53 }
 0x13d   :  { %v1669_v44 = vpop.f32.mrf.mxu0 }
 0x13f   :  { %v1670_v45 = vpop.f32.mrf.mxu0  ;;  %v1691_v46 = vpop.f32.mrf.mxu1 }
 0x140   :  { %v1671_v55 = vadd.f32 %v1670_v45, %v1669_v44 }
 0x141   :  { %v1672_v47 = vpop.f32.mrf.mxu0  ;;  %v1692_v48 = vpop.f32.mrf.mxu1 }
 0x142   :  { %v1168_v58 = vadd.f32 %v1671_v55, %v896_v56  ;;  %v1693_v59 = vadd.f32 %v1692_v48, %v1691_v46 }
 0x143   :  { %v1673_v49 = vpop.f32.mrf.mxu0  ;;  %v1694_v50 = vpop.f32.mrf.mxu1 }
 0x144   :  { %v1208_v62 = vadd.f32 %v1693_v59, %v1168_v58 }
 0x145   :  { %v1695_v51 = vpop.f32.mrf.mxu1 }
 0x155   :  { %v1247_v57 = vpop.f32.mrf.mxu0 }
 0x156   :  { %v1248_v0 = vadd.f32 %v1247_v57, %v1208_v62 }
 0x157   :  { %v1729_v60 = vpop.f32.mrf.mxu0 }
 0x159   :  { %v1250_v61 = vpop.f32.mrf.mxu0 }
 0x15b   :  { %v1730_v63 = vpop.f32.mrf.mxu0 }
 0x15d   :  { %v1301_v1 = vpop.f32.mrf.mxu0 }
 0x15e   :  { %v1307_v3 = vadd.f32 %v1301_v1, %v1248_v0 }
 0x15f   :  { %v1735_v4 = vpop.f32.mrf.mxu0 }
 0x160   :  { %v1315_v5 = vadd.f32 %v1555_v2, %v1307_v3 }
 0x161   :  { %v1304_v6 = vpop.f32.mrf.mxu0 }
 0x162   :  { %v1316_v7 = vmax.f32 %v1315_v5, 0.0 }
 0x163   :  { %v1736_v35 = vpop.f32.mrf.mxu0 }
 0x164   :  { %v1317_v8 = vpack.c.bf16 %v1316_v7, %v1316_v7 }
 0x166   :  { %1754 = vmatmul.mubr.bf16.vlgmr.msra.gmra.mxu1 %v1317_v8 }
 0x226   :  { %v1423_v10 = vpop.f32.mrf.mxu1 }
 0x227   :  { %v1424_v11 = vadd.f32 %v1556_v9, %v1423_v10 }
 0x228   :  { %v1755_v12 = vpop.f32.mrf.mxu1 }
 0x229   :  { %v1430_v13 = vsel %vm1429_vm3, %v1424_v11, -inf }
 0x22a   :  { %1431 = vmax.xlane.f32.xlu0 %v1430_v13  ;;  %v1426_v14 = vpop.f32.mrf.mxu1 }
 0x22c   :  { %v1756_v15 = vpop.f32.mrf.mxu1 }
 0x2b3   :  { %v1432_v16 = vpop.xlane.xlu0 %1431 }
 0x2b4   :  { %v1433_v17 = vsub.f32 %v1424_v11, %v1432_v16 }
 0x2b6   :  { %v1434_v18 = vmul.f32 1.442695, %v1433_v17 }
 0x2b8   :  { %1878 = vpow2.f32 %v1434_v18 }
 0x2c5   :  { %v1879_v19 = vpop.eup %1878 }
 0x2c6   :  { %v1436_v20 = vsel %vm1429_vm3, %v1879_v19, 0.0 }
 0x2c7   :  { %1437 = vadd.xlane.f32.xlu0 %v1436_v20 }
 0x350   :  { %v1438_v21 = vpop.xlane.xlu0 %1437 }
 0x351   :  { %1880 = vrcp.f32 %v1438_v21 }
 0x35e   :  { %v1881_v22 = vpop.eup %1880 }
 0x35f   :  { %v1440_v23 = vmul.f32 %v1881_v22, %v1879_v19 }
 0x361   :  { %v1441_v24 = vpack.c.bf16 %v1440_v23, %v1440_v23 }
 0x363   :  { %1442 = vst [vmem:[%s2060_s9] sm:$0x1] %v1441_v24 }
 0x364   :  { %1447 = vsyncpa [#allocation3], 1 }
 0x365   :  { %1448 = vsyncpa [#allocation5], 1 }

</bundles_post_ra>
